<compile_context>
chip_gen: v5e
topology: v5e:2x2
jax: 0.10.0
libtpu: 0.0.40
codegen_flags: <defaults>
</compile_context>

<pallas_src>
import jax
import jax.numpy as jnp
from jax.experimental import pallas as pl
from jax.experimental.pallas import tpu as pltpu

LANES = 128
TARGET_BLOCK_BYTES = 4 * 1024 * 1024      # per-operand block; x2 ops x2 bufs = 16 MiB
VMEM_LIMIT_BYTES = 32 * 1024 * 1024       # safe on v5e/v6e/v7x (<= physical everywhere)


def _copy_kernel(x_ref, o_ref):
    # Whole-tile lane-dense passthrough copy (unmasked vld/vst on full blocks).
    o_ref[...] = x_ref[...]


def _dma_copy_kernel(x_hbm, o_hbm, sem):
    # Direct HBM->HBM DMA; no VMEM staging, no (8,128) block constraint.
    cp = pltpu.make_async_copy(x_hbm, o_hbm, sem)
    cp.start()
    cp.wait()


def _round_up(n, m):
    return ((n + m - 1) // m) * m


def _sublane_rows(dtype):
    # 32-bit dtypes: 8 sublanes; bf16/f16: 16; int8/fp8: 32 (packed sublanes).
    itemsize = jnp.dtype(dtype).itemsize
    return max(8, 32 // max(1, itemsize))


def identity(x, *, donate_input: bool = False):
    """Pallas identity: y = x, same shape/dtype (bit-exact HBM copy)."""
    total = x.size
    if total == 0:
        return x  # nothing to copy

    itemsize = jnp.dtype(x.dtype).itemsize
    cost = pl.CostEstimate(
        flops=0, transcendentals=0, bytes_accessed=2 * total * itemsize
    )
    aliases = {0: 0} if donate_input else {}

    if total % LANES != 0:
        # Ragged element count: single HBM->HBM DMA, handles any shape/size
        # uniformly without VMEM residency or masked partial stores.
        flat = x.reshape(-1)
        y = pl.pallas_call(
            _dma_copy_kernel,
            out_shape=jax.ShapeDtypeStruct(flat.shape, flat.dtype),
            in_specs=[pl.BlockSpec(memory_space=pl.ANY)],
            out_specs=pl.BlockSpec(memory_space=pl.ANY),
            scratch_shapes=[pltpu.SemaphoreType.DMA],
            input_output_aliases=aliases,
            cost_estimate=cost,
        )(flat)
        return y.reshape(x.shape)

    # Hot path: lane-dense (rows, 128) 2D view, tiled row blocks.
    rows = total // LANES
    x2d = x.reshape(rows, LANES)

    sub = _sublane_rows(x.dtype)
    block_rows = _round_up(
        max(sub, TARGET_BLOCK_BYTES // (LANES * itemsize)), sub
    )
    if block_rows >= rows:
        # Whole array fits in one (small) block: full-extent block is always legal.
        block_rows = rows
    grid = (pl.cdiv(rows, block_rows),)  # ragged last block is clipped/masked

    y2d = pl.pallas_call(
        _copy_kernel,
        out_shape=jax.ShapeDtypeStruct((rows, LANES), x.dtype),
        grid=grid,
        in_specs=[pl.BlockSpec((block_rows, LANES), lambda i: (i, 0))],
        out_specs=pl.BlockSpec((block_rows, LANES), lambda i: (i, 0)),
        input_output_aliases=aliases,
        compiler_params=pltpu.CompilerParams(
            dimension_semantics=("parallel",),
            vmem_limit_bytes=VMEM_LIMIT_BYTES,
        ),
        cost_estimate=cost,
    )(x2d)
    return y2d.reshape(x.shape)


if __name__ == "__main__":
    key = jax.random.PRNGKey(0)
    x = jax.random.normal(key, (2, 4, 16, 16), dtype=jnp.float32)

    y = identity(x)
    jax.block_until_ready(y)

    assert y.shape == x.shape
    assert y.dtype == x.dtype
    assert bool(jnp.all(y == x))

    print("KERNEL_OK")
</pallas_src>

<mosaic_0001>
module attributes {stable_mosaic.version = 11 : i64} {
  func.func @_copy_kernel(%arg0: i32, %arg1: memref<16x128xf32, #tpu.memory_space<vmem>>, %arg2: memref<16x128xf32, #tpu.memory_space<vmem>>) attributes {dimension_semantics = [#tpu.dimension_semantics<parallel>], iteration_bounds = array<i64: 1>, scalar_prefetch = 0 : i64, scratch_operands = 0 : i64, tpu.core_type = #tpu.core_type<tc>, window_params = [{transform_indices = @transform_0, window_bounds = array<i64: 16, 128>}, {transform_indices = @transform_1, window_bounds = array<i64: 16, 128>}]} {
    %c0 = arith.constant 0 : index
    %c0_0 = arith.constant 0 : index
    %0 = vector.load %arg1[%c0, %c0_0] : memref<16x128xf32, #tpu.memory_space<vmem>>, vector<16x128xf32>
    %c0_1 = arith.constant 0 : index
    %c0_2 = arith.constant 0 : index
    %1 = vector.load %arg2[%c0_1, %c0_2] : memref<16x128xf32, #tpu.memory_space<vmem>>, vector<16x128xf32>
    tpu.vector_store %arg2[%c0_1, %c0_2], %0 {strides = array<i32>} : memref<16x128xf32, #tpu.memory_space<vmem>>, vector<16x128xf32>,
    return
  }
  func.func @transform_0(%arg0: i32) -> (i32, i32) {
    %c0_i32 = arith.constant 0 : i32
    %c0_i32_0 = arith.constant 0 : i32
    return %arg0, %c0_i32 : i32, i32
  }
  func.func @transform_1(%arg0: i32) -> (i32, i32) {
    %c0_i32 = arith.constant 0 : i32
    %c0_i32_0 = arith.constant 0 : i32
    return %arg0, %c0_i32 : i32, i32
  }
}

</mosaic_0001>

<bundles_post_ra>
// kernel: tpu_custom_call.1
= control target key start
LH: loop header
LB: loop body
LE: loop exit
PB: predicated region body
PF: predicated region fallthrough
CT: control target
= control target key end

     0   :  { %6 = vsyncpa [#allocation3], 0  ;;  %s124_s0 = inlined_call_operand.hbm [shape: f32[16,128], index: 0, kind: input, shape index: {}]   ;;  %s125_s1 = inlined_call_operand.hbm [shape: f32[16,128], index: 1, kind: output, shape index: {}]  }
   0x1   :  { %7 = vsyncpa [#allocation4], 0  ;;  %s12_s8 = sshll.u32 %s124_s0, 4  ;;  %s104_s9 = smov [#allocation2]   ;;  %s13_s8 = int_to_ptr.hbm [resolvable:$true] %s12_s8 }
   0x2   :  { %s14_s10 = sshll.u32 %s104_s9, 4  ;;  %s105_s11 = smov 128   ;;  %s15_s10 = int_to_ptr.vmem [resolvable:$true] %s14_s10 }
   0x3   :  { %s106_s12 = smov 8  }
   0x4   :  { %20 = dma.hbm_to_vmem [thread:$0]  %s13_s8, 256, %s15_s10, [#allocation3], %s105_s11, %s105_s11, %s106_s12  }
   0x5   :  { %100 = dma.done.wait [#allocation3], 256  }
   0x6   :  { %101 = vsyncadd [#allocation3], 4294967040  ;;  %s107_s13 = smov [#allocation5]   ;;  %s35_s17 = sshll.u32 %s125_s1, 4  ;;  %v25_v0 = vld [vmem:[#allocation2] sm:$0xff]  ;;  %v26_v1 = vld [vmem:[#allocation2 + $0x8] sm:$0xff]  ;;  %s36_s17 = int_to_ptr.hbm [resolvable:$true] %s35_s17 }
   0x7   :  { %s33_s14 = sshll.u32 %s107_s13, 4  ;;  %27 = vst [vmem:[#allocation5] sm:$0xff] %v25_v0  ;;  %s34_s14 = int_to_ptr.vmem [resolvable:$true] %s33_s14 }
   0x8   :  { %28 = vst [vmem:[#allocation5 + $0x8] sm:$0xff] %v26_v1 }
   0x9   :  { %41 = dma.vmem_to_hbm [thread:$0]  %s34_s14, 256, %s36_s17, [#allocation4], %s105_s11, %s105_s11, %s106_s12  }
   0xa   :  { %102 = dma.done.wait [#allocation4], 256  }
   0xb   :  { %103 = vsyncadd [#allocation4], 4294967040 }
   0xc   :  { %46 = vsyncpa [#allocation3], 1 }
   0xd   :  { %47 = vsyncpa [#allocation4], 1 }

</bundles_post_ra>
